<compile_context>
chip_gen: v5e
topology: v5e:2x2
jax: 0.10.0
libtpu: 0.0.40
codegen_flags: <defaults>
</compile_context>

<pallas_src>
from functools import partial

import jax
import jax.numpy as jnp
from jax.experimental import pallas as pl
from jax.experimental.pallas import tpu as pltpu


def mlp_kernel(x_ref,
               w1_ref, b1_ref,
               w2_ref, b2_ref,
               w3_ref, b3_ref,
               w4_ref, b4_ref,
               w5_ref, b5_ref,
               o_ref,
               *, compute_dtype):
    """One batch tile: all 5 matmuls + ReLUs fused, weights resident in VMEM."""

    def layer(h, w_ref, b_ref, relu):
        # Matmul inputs in compute_dtype (f32 or bf16); accumulation always f32.
        a = h.astype(compute_dtype)
        w = w_ref[...].astype(compute_dtype)
        y = jnp.dot(a, w, preferred_element_type=jnp.float32) + b_ref[...]
        return jnp.maximum(y, 0.0) if relu else y

    h = x_ref[...]
    h = layer(h, w1_ref, b1_ref, True)
    h = layer(h, w2_ref, b2_ref, True)
    h = layer(h, w3_ref, b3_ref, True)
    h = layer(h, w4_ref, b4_ref, True)
    out = layer(h, w5_ref, b5_ref, False)
    o_ref[...] = out.astype(o_ref.dtype)


def _round_up(n, m):
    return ((n + m - 1) // m) * m


def mlp_forward(x, params, *, tm=512, compute_dtype=jnp.float32):
    """x: (B, state_space_size) f32; params: list of (W, b) with W (in, out), b (1, out)."""
    B, S = x.shape
    A = params[-1][0].shape[1]

    # --- Lane-dense output: zero-pad the final layer's output dim to a multiple of 128 ---
    out_pad = max(128, _round_up(A, 128))
    w5, b5 = params[-1]
    pad_cols = out_pad - A
    w5p = jnp.pad(w5, ((0, 0), (0, pad_cols)))
    b5p = jnp.pad(b5, ((0, 0), (0, pad_cols)))
    padded_params = list(params[:-1]) + [(w5p, b5p)]

    # --- Batch tiling: TM rows per grid step (multiple of 8 for sublane alignment) ---
    b8 = _round_up(B, 8)
    TM = min(tm, b8)
    Bp = _round_up(B, TM)
    xp = jnp.pad(x, ((0, Bp - B), (0, 0)))

    flat_args = [xp]
    for (w, b) in padded_params:
        flat_args.append(w)
        flat_args.append(b)

    grid = (pl.cdiv(Bp, TM),)

    x_spec = pl.BlockSpec((TM, S), lambda i: (i, 0))
    # Weights / biases: full block, constant index_map -> VMEM-resident across grid steps.
    weight_specs = []
    for (w, b) in padded_params:
        weight_specs.append(pl.BlockSpec(w.shape, lambda i: (0, 0)))
        weight_specs.append(pl.BlockSpec(b.shape, lambda i: (0, 0)))
    out_spec = pl.BlockSpec((TM, out_pad), lambda i: (i, 0))

    out = pl.pallas_call(
        partial(mlp_kernel, compute_dtype=compute_dtype),
        out_shape=jax.ShapeDtypeStruct((Bp, out_pad), jnp.float32),
        grid=grid,
        in_specs=[x_spec] + weight_specs,
        out_specs=out_spec,
        compiler_params=pltpu.CompilerParams(
            dimension_semantics=("parallel",)),  # 2x on v7x (2 TCs); harmless on v5e/v6e
    )(*flat_args)

    return out[:B, :A]


def init_params(key, state_space_size, action_space_size):
    """Deterministic init mimicking PyTorch nn.Linear default (uniform(-1/sqrt(in), 1/sqrt(in)))."""
    dims = [state_space_size, 128, 128, 128, 128, action_space_size]
    params = []
    for i in range(5):
        fan_in, fan_out = dims[i], dims[i + 1]
        key, kw, kb = jax.random.split(key, 3)
        bound = 1.0 / jnp.sqrt(jnp.float32(fan_in))
        w = jax.random.uniform(kw, (fan_in, fan_out), jnp.float32, -bound, bound)
        b = jax.random.uniform(kb, (1, fan_out), jnp.float32, -bound, bound)
        params.append((w, b))
    return params


def reference_forward(x, params):
    h = x
    for i, (w, b) in enumerate(params):
        h = h @ w + b
        if i < 4:
            h = jnp.maximum(h, 0.0)
    return h


if __name__ == "__main__":
    state_space_size = 32
    action_space_size = 8

    key = jax.random.PRNGKey(0)
    key, kx_small, kx_big = jax.random.split(key, 3)
    params = init_params(key, state_space_size, action_space_size)

    # --- Small-batch correctness check (f32 compute, tight tolerance) ---
    batch = 8
    x = jax.random.normal(kx_small, (batch, state_space_size), jnp.float32)
    out = jax.block_until_ready(mlp_forward(x, params))
    ref = reference_forward(x, params)
    assert out.shape == (batch, action_space_size)
    assert jnp.allclose(out, ref, atol=1e-4, rtol=1e-4), "f32 mismatch vs reference"

    # --- Larger batch: exercises the batch grid (multiple TM=512 tiles), parallel semantics ---
    big_batch = 1024
    xb = jax.random.normal(kx_big, (big_batch, state_space_size), jnp.float32)
    out_big = jax.block_until_ready(mlp_forward(xb, params))
    ref_big = reference_forward(xb, params)
    assert out_big.shape == (big_batch, action_space_size)
    assert jnp.allclose(out_big, ref_big, atol=1e-4, rtol=1e-4), "f32 (tiled) mismatch"

    # --- bf16 MXU-input path (f32 accumulation): recommended on v6e/v7x, loose tolerance ---
    out_bf16 = jax.block_until_ready(
        mlp_forward(xb, params, compute_dtype=jnp.bfloat16))
    max_err = jnp.max(jnp.abs(out_bf16 - ref_big))
    assert out_bf16.shape == (big_batch, action_space_size)
    assert max_err < 0.1, f"bf16 path error too large: {max_err}"

    print("KERNEL_OK")
</pallas_src>

<mosaic_0001>
module attributes {stable_mosaic.version = 11 : i64} {
  func.func @mlp_kernel(%arg0: i32, %arg1: memref<8x32xf32, #tpu.memory_space<vmem>>, %arg2: memref<32x128xf32, #tpu.memory_space<vmem>>, %arg3: memref<1x128xf32, #tpu.memory_space<vmem>>, %arg4: memref<128x128xf32, #tpu.memory_space<vmem>>, %arg5: memref<1x128xf32, #tpu.memory_space<vmem>>, %arg6: memref<128x128xf32, #tpu.memory_space<vmem>>, %arg7: memref<1x128xf32, #tpu.memory_space<vmem>>, %arg8: memref<128x128xf32, #tpu.memory_space<vmem>>, %arg9: memref<1x128xf32, #tpu.memory_space<vmem>>, %arg10: memref<128x128xf32, #tpu.memory_space<vmem>>, %arg11: memref<1x128xf32, #tpu.memory_space<vmem>>, %arg12: memref<8x128xf32, #tpu.memory_space<vmem>>) attributes {dimension_semantics = [#tpu.dimension_semantics<parallel>], iteration_bounds = array<i64: 1>, scalar_prefetch = 0 : i64, scratch_operands = 0 : i64, tpu.core_type = #tpu.core_type<tc>, window_params = [{transform_indices = @transform_0, window_bounds = array<i64: 8, 32>}, {pipeline_mode = #tpu.pipeline_mode<synchronous>, transform_indices = @transform_1, window_bounds = array<i64: 32, 128>}, {pipeline_mode = #tpu.pipeline_mode<synchronous>, transform_indices = @transform_2, window_bounds = array<i64: 1, 128>}, {pipeline_mode = #tpu.pipeline_mode<synchronous>, transform_indices = @transform_3, window_bounds = array<i64: 128, 128>}, {pipeline_mode = #tpu.pipeline_mode<synchronous>, transform_indices = @transform_4, window_bounds = array<i64: 1, 128>}, {pipeline_mode = #tpu.pipeline_mode<synchronous>, transform_indices = @transform_5, window_bounds = array<i64: 128, 128>}, {pipeline_mode = #tpu.pipeline_mode<synchronous>, transform_indices = @transform_6, window_bounds = array<i64: 1, 128>}, {pipeline_mode = #tpu.pipeline_mode<synchronous>, transform_indices = @transform_7, window_bounds = array<i64: 128, 128>}, {pipeline_mode = #tpu.pipeline_mode<synchronous>, transform_indices = @transform_8, window_bounds = array<i64: 1, 128>}, {pipeline_mode = #tpu.pipeline_mode<synchronous>, transform_indices = @transform_9, window_bounds = array<i64: 128, 128>}, {pipeline_mode = #tpu.pipeline_mode<synchronous>, transform_indices = @transform_10, window_bounds = array<i64: 1, 128>}, {transform_indices = @transform_11, window_bounds = array<i64: 8, 128>}]} {
    %c0 = arith.constant 0 : index
    %c0_0 = arith.constant 0 : index
    %0 = vector.load %arg1[%c0, %c0_0] : memref<8x32xf32, #tpu.memory_space<vmem>>, vector<8x32xf32>
    %c0_1 = arith.constant 0 : index
    %c0_2 = arith.constant 0 : index
    %1 = vector.load %arg2[%c0_1, %c0_2] : memref<32x128xf32, #tpu.memory_space<vmem>>, vector<32x128xf32>
    %cst = arith.constant dense<0.000000e+00> : vector<8x128xf32>
    %2 = tpu.matmul %0, %1, %cst {dimension_numbers = #tpu.dot_dimension_numbers<[1], [0], [0], [1], [0, 0, 1, 1], [], []>} : vector<8x32xf32>, vector<32x128xf32>, vector<8x128xf32> -> vector<8x128xf32>
    %c0_3 = arith.constant 0 : index
    %c0_4 = arith.constant 0 : index
    %3 = vector.load %arg3[%c0_3, %c0_4] : memref<1x128xf32, #tpu.memory_space<vmem>>, vector<1x128xf32>
    %4 = vector.broadcast %3 : vector<1x128xf32> to vector<8x128xf32>
    %5 = arith.addf %2, %4 : vector<8x128xf32>
    %cst_5 = arith.constant 0.000000e+00 : f32
    %6 = vector.broadcast %cst_5 : f32 to vector<8x128xf32>
    %7 = arith.maximumf %5, %6 : vector<8x128xf32>
    %c0_6 = arith.constant 0 : index
    %c0_7 = arith.constant 0 : index
    %8 = vector.load %arg4[%c0_6, %c0_7] : memref<128x128xf32, #tpu.memory_space<vmem>>, vector<128x128xf32>
    %cst_8 = arith.constant dense<0.000000e+00> : vector<8x128xf32>
    %9 = tpu.matmul %7, %8, %cst_8 {dimension_numbers = #tpu.dot_dimension_numbers<[1], [0], [0], [1], [0, 0, 1, 1], [], []>} : vector<8x128xf32>, vector<128x128xf32>, vector<8x128xf32> -> vector<8x128xf32>
    %c0_9 = arith.constant 0 : index
    %c0_10 = arith.constant 0 : index
    %10 = vector.load %arg5[%c0_9, %c0_10] : memref<1x128xf32, #tpu.memory_space<vmem>>, vector<1x128xf32>
    %11 = vector.broadcast %10 : vector<1x128xf32> to vector<8x128xf32>
    %12 = arith.addf %9, %11 : vector<8x128xf32>
    %cst_11 = arith.constant 0.000000e+00 : f32
    %13 = vector.broadcast %cst_11 : f32 to vector<8x128xf32>
    %14 = arith.maximumf %12, %13 : vector<8x128xf32>
    %c0_12 = arith.constant 0 : index
    %c0_13 = arith.constant 0 : index
    %15 = vector.load %arg6[%c0_12, %c0_13] : memref<128x128xf32, #tpu.memory_space<vmem>>, vector<128x128xf32>
    %cst_14 = arith.constant dense<0.000000e+00> : vector<8x128xf32>
    %16 = tpu.matmul %14, %15, %cst_14 {dimension_numbers = #tpu.dot_dimension_numbers<[1], [0], [0], [1], [0, 0, 1, 1], [], []>} : vector<8x128xf32>, vector<128x128xf32>, vector<8x128xf32> -> vector<8x128xf32>
    %c0_15 = arith.constant 0 : index
    %c0_16 = arith.constant 0 : index
    %17 = vector.load %arg7[%c0_15, %c0_16] : memref<1x128xf32, #tpu.memory_space<vmem>>, vector<1x128xf32>
    %18 = vector.broadcast %17 : vector<1x128xf32> to vector<8x128xf32>
    %19 = arith.addf %16, %18 : vector<8x128xf32>
    %cst_17 = arith.constant 0.000000e+00 : f32
    %20 = vector.broadcast %cst_17 : f32 to vector<8x128xf32>
    %21 = arith.maximumf %19, %20 : vector<8x128xf32>
    %c0_18 = arith.constant 0 : index
    %c0_19 = arith.constant 0 : index
    %22 = vector.load %arg8[%c0_18, %c0_19] : memref<128x128xf32, #tpu.memory_space<vmem>>, vector<128x128xf32>
    %cst_20 = arith.constant dense<0.000000e+00> : vector<8x128xf32>
    %23 = tpu.matmul %21, %22, %cst_20 {dimension_numbers = #tpu.dot_dimension_numbers<[1], [0], [0], [1], [0, 0, 1, 1], [], []>} : vector<8x128xf32>, vector<128x128xf32>, vector<8x128xf32> -> vector<8x128xf32>
    %c0_21 = arith.constant 0 : index
    %c0_22 = arith.constant 0 : index
    %24 = vector.load %arg9[%c0_21, %c0_22] : memref<1x128xf32, #tpu.memory_space<vmem>>, vector<1x128xf32>
    %25 = vector.broadcast %24 : vector<1x128xf32> to vector<8x128xf32>
    %26 = arith.addf %23, %25 : vector<8x128xf32>
    %cst_23 = arith.constant 0.000000e+00 : f32
    %27 = vector.broadcast %cst_23 : f32 to vector<8x128xf32>
    %28 = arith.maximumf %26, %27 : vector<8x128xf32>
    %c0_24 = arith.constant 0 : index
    %c0_25 = arith.constant 0 : index
    %29 = vector.load %arg10[%c0_24, %c0_25] : memref<128x128xf32, #tpu.memory_space<vmem>>, vector<128x128xf32>
    %cst_26 = arith.constant dense<0.000000e+00> : vector<8x128xf32>
    %30 = tpu.matmul %28, %29, %cst_26 {dimension_numbers = #tpu.dot_dimension_numbers<[1], [0], [0], [1], [0, 0, 1, 1], [], []>} : vector<8x128xf32>, vector<128x128xf32>, vector<8x128xf32> -> vector<8x128xf32>
    %c0_27 = arith.constant 0 : index
    %c0_28 = arith.constant 0 : index
    %31 = vector.load %arg11[%c0_27, %c0_28] : memref<1x128xf32, #tpu.memory_space<vmem>>, vector<1x128xf32>
    %32 = vector.broadcast %31 : vector<1x128xf32> to vector<8x128xf32>
    %33 = arith.addf %30, %32 : vector<8x128xf32>
    %c0_29 = arith.constant 0 : index
    %c0_30 = arith.constant 0 : index
    %34 = vector.load %arg12[%c0_29, %c0_30] : memref<8x128xf32, #tpu.memory_space<vmem>>, vector<8x128xf32>
    tpu.vector_store %arg12[%c0_29, %c0_30], %33 {strides = array<i32>} : memref<8x128xf32, #tpu.memory_space<vmem>>, vector<8x128xf32>,
    return
  }
  func.func @transform_0(%arg0: i32) -> (i32, i32) {
    %c0_i32 = arith.constant 0 : i32
    %c0_i32_0 = arith.constant 0 : i32
    return %arg0, %c0_i32 : i32, i32
  }
  func.func @transform_1(%arg0: i32) -> (i32, i32) {
    %c0_i32 = arith.constant 0 : i32
    %c0_i32_0 = arith.constant 0 : i32
    %c0_i32_1 = arith.constant 0 : i32
    return %c0_i32, %c0_i32_0 : i32, i32
  }
  func.func @transform_2(%arg0: i32) -> (i32, i32) {
    %c0_i32 = arith.constant 0 : i32
    %c0_i32_0 = arith.constant 0 : i32
    %c0_i32_1 = arith.constant 0 : i32
    return %c0_i32, %c0_i32_0 : i32, i32
  }
  func.func @transform_3(%arg0: i32) -> (i32, i32) {
    %c0_i32 = arith.constant 0 : i32
    %c0_i32_0 = arith.constant 0 : i32
    %c0_i32_1 = arith.constant 0 : i32
    return %c0_i32, %c0_i32_0 : i32, i32
  }
  func.func @transform_4(%arg0: i32) -> (i32, i32) {
    %c0_i32 = arith.constant 0 : i32
    %c0_i32_0 = arith.constant 0 : i32
    %c0_i32_1 = arith.constant 0 : i32
    return %c0_i32, %c0_i32_0 : i32, i32
  }
  func.func @transform_5(%arg0: i32) -> (i32, i32) {
    %c0_i32 = arith.constant 0 : i32
    %c0_i32_0 = arith.constant 0 : i32
    %c0_i32_1 = arith.constant 0 : i32
    return %c0_i32, %c0_i32_0 : i32, i32
  }
  func.func @transform_6(%arg0: i32) -> (i32, i32) {
    %c0_i32 = arith.constant 0 : i32
    %c0_i32_0 = arith.constant 0 : i32
    %c0_i32_1 = arith.constant 0 : i32
    return %c0_i32, %c0_i32_0 : i32, i32
  }
  func.func @transform_7(%arg0: i32) -> (i32, i32) {
    %c0_i32 = arith.constant 0 : i32
    %c0_i32_0 = arith.constant 0 : i32
    %c0_i32_1 = arith.constant 0 : i32
    return %c0_i32, %c0_i32_0 : i32, i32
  }
  func.func @transform_8(%arg0: i32) -> (i32, i32) {
    %c0_i32 = arith.constant 0 : i32
    %c0_i32_0 = arith.constant 0 : i32
    %c0_i32_1 = arith.constant 0 : i32
    return %c0_i32, %c0_i32_0 : i32, i32
  }
  func.func @transform_9(%arg0: i32) -> (i32, i32) {
    %c0_i32 = arith.constant 0 : i32
    %c0_i32_0 = arith.constant 0 : i32
    %c0_i32_1 = arith.constant 0 : i32
    return %c0_i32, %c0_i32_0 : i32, i32
  }
  func.func @transform_10(%arg0: i32) -> (i32, i32) {
    %c0_i32 = arith.constant 0 : i32
    %c0_i32_0 = arith.constant 0 : i32
    %c0_i32_1 = arith.constant 0 : i32
    return %c0_i32, %c0_i32_0 : i32, i32
  }
  func.func @transform_11(%arg0: i32) -> (i32, i32) {
    %c0_i32 = arith.constant 0 : i32
    %c0_i32_0 = arith.constant 0 : i32
    return %arg0, %c0_i32 : i32, i32
  }
}

</mosaic_0001>

<bundles_post_ra>
// kernel: tpu_custom_call.1
= control target key start
LH: loop header
LB: loop body
LE: loop exit
PB: predicated region body
PF: predicated region fallthrough
CT: control target
= control target key end

     0   :  { %16 = vsyncpa [#allocation3], 0  ;;  %s662_s0 = inlined_call_operand.hbm [shape: f32[8,32], index: 0, kind: input, shape index: {}]   ;;  %s663_s1 = inlined_call_operand.hbm [shape: f32[32,128], index: 1, kind: input, shape index: {}]   ;;  %s664_s2 = inlined_call_operand.vmem [shape: f32[1,128], index: 2, kind: input, shape index: {}]   ;;  %s665_s3 = inlined_call_operand.hbm [shape: f32[128,128], index: 3, kind: input, shape index: {}]   ;;  %s666_s4 = inlined_call_operand.vmem [shape: f32[1,128], index: 4, kind: input, shape index: {}]   ;;  %s667_s5 = inlined_call_operand.hbm [shape: f32[128,128], index: 5, kind: input, shape index: {}]   ;;  %s668_s6 = inlined_call_operand.vmem [shape: f32[1,128], index: 6, kind: input, shape index: {}]   ;;  %s669_s7 = inlined_call_operand.hbm [shape: f32[128,128], index: 7, kind: input, shape index: {}]   ;;  %s670_s8 = inlined_call_operand.vmem [shape: f32[1,128], index: 8, kind: input, shape index: {}]   ;;  %s671_s9 = inlined_call_operand.hbm [shape: f32[128,128], index: 9, kind: input, shape index: {}]   ;;  %s672_s10 = inlined_call_operand.vmem [shape: f32[1,128], index: 10, kind: input, shape index: {}]   ;;  %s673_s11 = inlined_call_operand.hbm [shape: f32[8,128], index: 11, kind: output, shape index: {}]  }
   0x1   :  { %17 = vsyncpa [#allocation6], 0 }
   0x2   :  { %18 = vsyncpa [#allocation9], 0 }
   0x3   :  { %19 = vsyncpa [#allocation12], 0  ;;  %s36_s19 = sshll.u32 %s663_s1, 4  ;;  %s37_s19 = int_to_ptr.hbm [resolvable:$true] %s36_s19 }
   0x4   :  { %20 = vsyncpa [#allocation4], 0  ;;  %s542_s20 = smov [#allocation5]   ;;  %s66_s24 = sshll.u32 %s667_s5, 4  ;;  %s67_s24 = int_to_ptr.hbm [resolvable:$true] %s66_s24 }
   0x5   :  { %s38_s21 = sshll.u32 %s542_s20, 4  ;;  %s543_s25 = smov 128   ;;  %s39_s21 = int_to_ptr.vmem [resolvable:$true] %s38_s21 }
   0x6   :  { %s544_s26 = smov 8   ;;  %s545_s27 = smov [#allocation8]  }
   0x7   :  { %44 = dma.hbm_to_vmem [thread:$0]  %s37_s19, 512, %s39_s21, [#allocation6], %s543_s25, %s543_s25, %s544_s26  }
   0x8   :  { %s68_s28 = sshll.u32 %s545_s27, 4  ;;  %s26_s30 = sshll.u32 %s662_s0, 4  ;;  %s69_s28 = int_to_ptr.vmem [resolvable:$true] %s68_s28  ;;  %s27_s30 = int_to_ptr.hbm [resolvable:$true] %s26_s30 }
   0x9   :  { %74 = dma.hbm_to_vmem [thread:$0]  %s67_s24, 2048, %s69_s28, [#allocation9], %s543_s25, %s543_s25, %s544_s26  }
   0xa   :  { %s51_s13 = sshll.u32 %s665_s3, 4  ;;  %s546_s14 = smov [#allocation2]   ;;  %s52_s13 = int_to_ptr.hbm [resolvable:$true] %s51_s13 }
   0xb   :  { %s28_s15 = sshll.u32 %s546_s14, 4  ;;  %s547_s16 = smov [#allocation7]   ;;  %s29_s15 = int_to_ptr.vmem [resolvable:$true] %s28_s15 }
   0xc   :  { %31 = dma.hbm_to_vmem [thread:$0]  %s27_s30, 128, %s29_s15, [#allocation3]  }
   0xd   :  { %s53_s17 = sshll.u32 %s547_s16, 4  ;;  %s81_s0 = sshll.u32 %s669_s7, 4  ;;  %s54_s17 = int_to_ptr.vmem [resolvable:$true] %s53_s17  ;;  %s82_s0 = int_to_ptr.hbm [resolvable:$true] %s81_s0 }
   0xe   :  { %59 = dma.hbm_to_vmem [thread:$0]  %s52_s13, 2048, %s54_s17, [#allocation6], %s543_s25, %s543_s25, %s544_s26  }
   0xf   :  { %s96_s3 = sshll.u32 %s671_s9, 4  ;;  %s548_s22 = smov [#allocation10]   ;;  %s97_s3 = int_to_ptr.hbm [resolvable:$true] %s96_s3 }
  0x10   :  { %s83_s23 = sshll.u32 %s548_s22, 4  ;;  %s549_s24 = smov [#allocation11]   ;;  %s84_s23 = int_to_ptr.vmem [resolvable:$true] %s83_s23 }
  0x11   :  { %89 = dma.hbm_to_vmem [thread:$0]  %s82_s0, 2048, %s84_s23, [#allocation9], %s543_s25, %s543_s25, %s544_s26  }
  0x12   :  { %s98_s7 = sshll.u32 %s549_s24, 4  ;;  %s99_s7 = int_to_ptr.vmem [resolvable:$true] %s98_s7 }
  0x13   :  { %104 = dma.hbm_to_vmem [thread:$0]  %s97_s3, 2048, %s99_s7, [#allocation12], %s543_s25, %s543_s25, %s544_s26  }
  0x14   :  { %532 = dma.done.wait [#allocation3], 128  }
  0x15   :  { %533 = vsyncadd [#allocation3], 4294967168 }
  0x16   :  { %534 = dma.done.wait [#allocation6], 2560  }
  0x17   :  { %535 = vsyncadd [#allocation6], 4294964736 }
  0x18   :  { %536 = dma.done.wait [#allocation9], 4096  }
  0x19   :  { %537 = vsyncadd [#allocation9], 4294963200 }
  0x1a   :  { %538 = dma.done.wait [#allocation12], 2048  }
  0x1b   :  { %539 = vsyncadd [#allocation12], 4294965248  ;;  %v135_v0 = vld [vmem:[#allocation5 + $0x18] sm:$0xff]  ;;  %v134_v1 = vld [vmem:[#allocation5 + $0x10] sm:$0xff]  ;;  %vm140_vm0 = vcmask 261120   ;;  %s550_s30 = smov [#allocation13]  }
  0x1c   :  { %156 = vmatpush.msra.mxu0 %v135_v0  ;;  %v180_v2 = vld [vmem:[#allocation7 + $0x78] sm:$0xff]  ;;  %v133_v3 = vld [vmem:[#allocation5 + $0x8] sm:$0xff]  ;;  %v179_v4 = vld [vmem:[#allocation7 + $0x70] sm:$0xff]  ;;  %s334_s5 = sshll.u32 %s550_s30, 4  ;;  %s336_s14 = sshll.u32 %s673_s11, 4  ;;  %s335_s5 = int_to_ptr.vmem [resolvable:$true] %s334_s5  ;;  %s337_s14 = int_to_ptr.hbm [resolvable:$true] %s336_s14 }
  0x1d   :  { %185 = vmatpush.msra.mxu1 %v180_v2  ;;  %v178_v5 = vld [vmem:[#allocation7 + $0x68] sm:$0xff]  ;;  %v132_v6 = vld [vmem:[#allocation5] sm:$0xff]  ;;  %v131_v7 = vld [vmem:[#allocation2] sm:$0xff] }
  0x1e   :  { %157 = vmatpush.msra.mxu0 %v134_v1  ;;  %v177_v8 = vld [vmem:[#allocation7 + $0x60] sm:$0xff]  ;;  %v176_v9 = vld [vmem:[#allocation7 + $0x58] sm:$0xff]  ;;  %v175_v10 = vld [vmem:[#allocation7 + $0x50] sm:$0xff] }
  0x1f   :  { %186 = vmatpush.msra.mxu1 %v179_v4  ;;  %v174_v11 = vld [vmem:[#allocation7 + $0x48] sm:$0xff]  ;;  %v173_v12 = vld [vmem:[#allocation7 + $0x40] sm:$0xff]  ;;  %v172_v13 = vld [vmem:[#allocation7 + $0x38] sm:$0xff] }
  0x20   :  { %158 = vmatpush.msra.mxu0 %v133_v3  ;;  %v171_v14 = vld [vmem:[#allocation7 + $0x30] sm:$0xff]  ;;  %v170_v15 = vld [vmem:[#allocation7 + $0x28] sm:$0xff]  ;;  %v169_v16 = vld [vmem:[#allocation7 + $0x20] sm:$0xff] }
  0x21   :  { %187 = vmatpush.msra.mxu1 %v178_v5  ;;  %v168_v17 = vld [vmem:[#allocation7 + $0x18] sm:$0xff]  ;;  %v167_v18 = vld [vmem:[#allocation7 + $0x10] sm:$0xff]  ;;  %v166_v19 = vld [vmem:[#allocation7 + $0x8] sm:$0xff] }
  0x22   :  { %159 = vmatpush.msra.mxu0 %v132_v6  ;;  %v165_v20 = vld [vmem:[#allocation7] sm:$0xff]  ;;  %v221_v21 = vld [vmem:[#allocation8 + $0x78] sm:$0xff]  ;;  %v220_v22 = vld [vmem:[#allocation8 + $0x70] sm:$0xff] }
  0x23   :  { %349 = vmatmul.msk.f32.vlgmr.msra.gmra.mxu0 %vm140_vm0, %v131_v7  ;;  %188 = vmatpush.msra.mxu1 %v177_v8  ;;  %v219_v23 = vld [vmem:[#allocation8 + $0x68] sm:$0xff]  ;;  %v218_v24 = vld [vmem:[#allocation8 + $0x60] sm:$0xff]  ;;  %v217_v25 = vld [vmem:[#allocation8 + $0x58] sm:$0xff] }
  0x24   :  { %226 = vmatpush.msra.mxu2 %v221_v21  ;;  %v216_v26 = vld [vmem:[#allocation8 + $0x50] sm:$0xff]  ;;  %v215_v27 = vld [vmem:[#allocation8 + $0x48] sm:$0xff]  ;;  %v214_v28 = vld [vmem:[#allocation8 + $0x40] sm:$0xff] }
  0x25   :  { %189 = vmatpush.msra.mxu1 %v176_v9  ;;  %v213_v29 = vld [vmem:[#allocation8 + $0x38] sm:$0xff]  ;;  %v212_v30 = vld [vmem:[#allocation8 + $0x30] sm:$0xff]  ;;  %v211_v31 = vld [vmem:[#allocation8 + $0x28] sm:$0xff] }
  0x26   :  { %227 = vmatpush.msra.mxu2 %v220_v22  ;;  %v210_v32 = vld [vmem:[#allocation8 + $0x20] sm:$0xff]  ;;  %v209_v33 = vld [vmem:[#allocation8 + $0x18] sm:$0xff]  ;;  %v208_v38 = vld [vmem:[#allocation8 + $0x10] sm:$0xff] }
  0x27   :  { %190 = vmatpush.msra.mxu1 %v175_v10  ;;  %v359_v34 = vld [vmem:[%s664_s2] ss:$0 sm:$0xff]  ;;  %v207_v39 = vld [vmem:[#allocation8 + $0x8] sm:$0xff]  ;;  %v206_v40 = vld [vmem:[#allocation8] sm:$0xff] }
  0x28   :  { %228 = vmatpush.msra.mxu2 %v219_v23  ;;  %v262_v41 = vld [vmem:[#allocation10 + $0x78] sm:$0xff]  ;;  %v261_v42 = vld [vmem:[#allocation10 + $0x70] sm:$0xff]  ;;  %v260_v43 = vld [vmem:[#allocation10 + $0x68] sm:$0xff] }
  0x29   :  { %191 = vmatpush.msra.mxu1 %v174_v11  ;;  %267 = vmatpush.msra.mxu3 %v262_v41  ;;  %v259_v44 = vld [vmem:[#allocation10 + $0x60] sm:$0xff]  ;;  %v258_v45 = vld [vmem:[#allocation10 + $0x58] sm:$0xff]  ;;  %v257_v46 = vld [vmem:[#allocation10 + $0x50] sm:$0xff] }
  0x2a   :  { %229 = vmatpush.msra.mxu2 %v218_v24  ;;  %v256_v47 = vld [vmem:[#allocation10 + $0x48] sm:$0xff]  ;;  %v255_v48 = vld [vmem:[#allocation10 + $0x40] sm:$0xff]  ;;  %v254_v49 = vld [vmem:[#allocation10 + $0x38] sm:$0xff] }
  0x2b   :  { %192 = vmatpush.msra.mxu1 %v173_v12  ;;  %268 = vmatpush.msra.mxu3 %v261_v42  ;;  %v253_v50 = vld [vmem:[#allocation10 + $0x30] sm:$0xff]  ;;  %v252_v51 = vld [vmem:[#allocation10 + $0x28] sm:$0xff]  ;;  %v251_v52 = vld [vmem:[#allocation10 + $0x20] sm:$0xff] }
  0x2c   :  { %230 = vmatpush.msra.mxu2 %v217_v25  ;;  %v250_v53 = vld [vmem:[#allocation10 + $0x18] sm:$0xff]  ;;  %v249_v58 = vld [vmem:[#allocation10 + $0x10] sm:$0xff]  ;;  %v248_v59 = vld [vmem:[#allocation10 + $0x8] sm:$0xff] }
  0x2d   :  { %193 = vmatpush.msra.mxu1 %v172_v13  ;;  %269 = vmatpush.msra.mxu3 %v260_v43  ;;  %v360_v54 = vld [vmem:[%s666_s4] ss:$0 sm:$0xff]  ;;  %v247_v60 = vld [vmem:[#allocation10] sm:$0xff]  ;;  %v302_v62 = vld [vmem:[#allocation11 + $0x70] sm:$0xff] }
  0x2e   :  { %231 = vmatpush.msra.mxu2 %v216_v26  ;;  %v303_v61 = vld [vmem:[#allocation11 + $0x78] sm:$0xff]  ;;  %v301_v63 = vld [vmem:[#allocation11 + $0x68] sm:$0xff]  ;;  %v300_v0 = vld [vmem:[#allocation11 + $0x60] sm:$0xff] }
  0x2f   :  { %194 = vmatpush.msra.mxu1 %v171_v14  ;;  %270 = vmatpush.msra.mxu3 %v259_v44  ;;  %v299_v1 = vld [vmem:[#allocation11 + $0x58] sm:$0xff]  ;;  %v298_v2 = vld [vmem:[#allocation11 + $0x50] sm:$0xff]  ;;  %v297_v3 = vld [vmem:[#allocation11 + $0x48] sm:$0xff] }
  0x30   :  { %232 = vmatpush.msra.mxu2 %v215_v27  ;;  %308 = vmatpush.msrb.mxu0 %v303_v61  ;;  %v296_v4 = vld [vmem:[#allocation11 + $0x40] sm:$0xff]  ;;  %v295_v5 = vld [vmem:[#allocation11 + $0x38] sm:$0xff]  ;;  %v294_v6 = vld [vmem:[#allocation11 + $0x30] sm:$0xff] }
  0x31   :  { %195 = vmatpush.msra.mxu1 %v170_v15  ;;  %271 = vmatpush.msra.mxu3 %v258_v45  ;;  %v293_v7 = vld [vmem:[#allocation11 + $0x28] sm:$0xff]  ;;  %v292_v8 = vld [vmem:[#allocation11 + $0x20] sm:$0xff]  ;;  %v291_v9 = vld [vmem:[#allocation11 + $0x18] sm:$0xff] }
  0x32   :  { %233 = vmatpush.msra.mxu2 %v214_v28  ;;  %309 = vmatpush.msrb.mxu0 %v302_v62  ;;  %v361_v10 = vld [vmem:[%s668_s6] ss:$0 sm:$0xff]  ;;  %v290_v14 = vld [vmem:[#allocation11 + $0x10] sm:$0xff]  ;;  %v289_v15 = vld [vmem:[#allocation11 + $0x8] sm:$0xff] }
  0x33   :  { %196 = vmatpush.msra.mxu1 %v169_v16  ;;  %272 = vmatpush.msra.mxu3 %v257_v46  ;;  %v288_v16 = vld [vmem:[#allocation11] sm:$0xff]  ;;  %v363_v21 = vld [vmem:[%s672_s10] ss:$0 sm:$0xff] }
  0x34   :  { %234 = vmatpush.msra.mxu2 %v213_v29  ;;  %310 = vmatpush.msrb.mxu0 %v301_v63 }
  0x35   :  { %197 = vmatpush.msra.mxu1 %v168_v17  ;;  %273 = vmatpush.msra.mxu3 %v256_v47  ;;  %v362_v17 = vld [vmem:[%s670_s8] ss:$0 sm:$0xff] }
  0x36   :  { %235 = vmatpush.msra.mxu2 %v212_v30  ;;  %311 = vmatpush.msrb.mxu0 %v300_v0 }
  0x37   :  { %198 = vmatpush.msra.mxu1 %v167_v18  ;;  %274 = vmatpush.msra.mxu3 %v255_v48 }
  0x38   :  { %236 = vmatpush.msra.mxu2 %v211_v31  ;;  %312 = vmatpush.msrb.mxu0 %v299_v1 }
  0x39   :  { %199 = vmatpush.msra.mxu1 %v166_v19  ;;  %275 = vmatpush.msra.mxu3 %v254_v49 }
  0x3a   :  { %237 = vmatpush.msra.mxu2 %v210_v32  ;;  %313 = vmatpush.msrb.mxu0 %v298_v2 }
  0x3b   :  { %200 = vmatpush.msra.mxu1 %v165_v20  ;;  %276 = vmatpush.msra.mxu3 %v253_v50 }
  0x3c   :  { %238 = vmatpush.msra.mxu2 %v209_v33  ;;  %314 = vmatpush.msrb.mxu0 %v297_v3 }
  0x3d   :  { %277 = vmatpush.msra.mxu3 %v252_v51 }
  0x3e   :  { %239 = vmatpush.msra.mxu2 %v208_v38  ;;  %315 = vmatpush.msrb.mxu0 %v296_v4 }
  0x3f   :  { %278 = vmatpush.msra.mxu3 %v251_v52 }
  0x40   :  { %240 = vmatpush.msra.mxu2 %v207_v39  ;;  %316 = vmatpush.msrb.mxu0 %v295_v5 }
  0x41   :  { %279 = vmatpush.msra.mxu3 %v250_v53 }
  0x42   :  { %241 = vmatpush.msra.mxu2 %v206_v40  ;;  %317 = vmatpush.msrb.mxu0 %v294_v6 }
  0x43   :  { %280 = vmatpush.msra.mxu3 %v249_v58 }
  0x44   :  { %318 = vmatpush.msrb.mxu0 %v293_v7 }
  0x45   :  { %281 = vmatpush.msra.mxu3 %v248_v59 }
  0x46   :  { %319 = vmatpush.msrb.mxu0 %v292_v8 }
  0x47   :  { %282 = vmatpush.msra.mxu3 %v247_v60 }
  0x48   :  { %320 = vmatpush.msrb.mxu0 %v291_v9 }
  0x4a   :  { %321 = vmatpush.msrb.mxu0 %v290_v14 }
  0x4c   :  { %322 = vmatpush.msrb.mxu0 %v289_v15 }
  0x4e   :  { %323 = vmatpush.msrb.mxu0 %v288_v16 }
  0xa0   :  { %v161_v35 = vpop.f32.mrf.mxu0 }
  0xa1   :  { %v162_v36 = vadd.f32 %v359_v34, %v161_v35 }
  0xa3   :  { %v164_v37 = vmax.f32 %v162_v36, 0.0 }
  0xa5   :  { %201 = vmatmul.f32.vlgmr.msra.gmra.mxu1 %v164_v37 }
 0x122   :  { %v202_v55 = vpop.f32.mrf.mxu1 }
 0x123   :  { %v203_v56 = vadd.f32 %v360_v54, %v202_v55 }
 0x125   :  { %v205_v57 = vmax.f32 %v203_v56, 0.0 }
 0x127   :  { %242 = vmatmul.f32.vlgmr.msra.gmra.mxu2 %v205_v57 }
 0x1aa   :  { %v243_v11 = vpop.f32.mrf.mxu2 }
 0x1ab   :  { %v244_v12 = vadd.f32 %v361_v10, %v243_v11 }
 0x1ad   :  { %v246_v13 = vmax.f32 %v244_v12, 0.0 }
 0x1af   :  { %283 = vmatmul.f32.vlgmr.msra.gmra.mxu3 %v246_v13 }
 0x232   :  { %v284_v18 = vpop.f32.mrf.mxu3 }
 0x233   :  { %v285_v19 = vadd.f32 %v362_v17, %v284_v18 }
 0x235   :  { %v287_v20 = vmax.f32 %v285_v19, 0.0 }
 0x237   :  { %324 = vmatmul.f32.vlgmr.msrb.gmra.mxu0 %v287_v20 }
 0x2b4   :  { %v325_v22 = vpop.f32.mrf.mxu0 }
 0x2b5   :  { %v326_v23 = vadd.f32 %v363_v21, %v325_v22 }
 0x2b7   :  { %328 = vst [vmem:[#allocation13] sm:$0xff] %v326_v23 }
 0x2b8   :  { %339 = dma.vmem_to_hbm [thread:$0]  %s335_s5, 128, %s337_s14, [#allocation4]  }
 0x2b9   :  { %540 = dma.done.wait [#allocation4], 128  }
 0x2ba   :  { %541 = vsyncadd [#allocation4], 4294967168 }
 0x2bb   :  { %344 = vsyncpa [#allocation3], 1 }
 0x2bc   :  { %345 = vsyncpa [#allocation6], 1 }
 0x2bd   :  { %346 = vsyncpa [#allocation9], 1 }
 0x2be   :  { %347 = vsyncpa [#allocation12], 1 }
 0x2bf   :  { %348 = vsyncpa [#allocation4], 1 }

</bundles_post_ra>
